<compile_context>
chip_gen: v7x
topology: tpu7x:2x2x1
jax: 0.10.0
libtpu: 0.0.40
codegen_flags: <defaults>
</compile_context>

<pallas_src>
import jax
import jax.numpy as jnp
from jax.experimental import pallas as pl
from jax.experimental.pallas import tpu as pltpu

LANE = 128
SUBLANE = 8


def _round_up(x, m):
    return ((x + m - 1) // m) * m


def _cdiv(a, b):
    return (a + b - 1) // b


def critic_kernel(x_ref, w1_ref, b1_ref, w2_ref, b2_ref, w3_ref, b3_ref, out_ref):
    # fc1 (concat fused host-side) + relu.  bf16 MXU operands, f32 accumulate,
    # bias/relu in f32.
    x = x_ref[...].astype(jnp.bfloat16)                               # (TM, S+A)
    h1 = jnp.dot(x, w1_ref[...], preferred_element_type=jnp.float32) + b1_ref[...]
    h1 = jnp.maximum(h1, 0.0)                                         # (TM, Hp) f32

    # fc2 + relu
    h2 = jnp.dot(h1.astype(jnp.bfloat16), w2_ref[...],
                 preferred_element_type=jnp.float32) + b2_ref[...]
    h2 = jnp.maximum(h2, 0.0)                                         # (TM, Hp) f32

    # fc3: w3 is zero-padded to (Hp, 128) so the output tile is lane-dense
    # (unmasked vst); only column 0 is meaningful.  b3 scalar comes from SMEM.
    q = jnp.dot(h2.astype(jnp.bfloat16), w3_ref[...],
                preferred_element_type=jnp.float32)                   # (TM, 128)
    out_ref[...] = q + b3_ref[0, 0]


def critic_forward(state, action, params, *, block_b=256):
    """Pallas-backed Critic.forward(state, action) -> (B, 1) f32."""
    w1, b1, w2, b2, w3, b3 = params
    state = jnp.asarray(state, jnp.float32)
    action = jnp.asarray(action, jnp.float32)

    B, S = state.shape
    A = action.shape[1]
    H = w2.shape[0]
    K = S + A

    # ---- host-side parameter plumbing (tiny, weight-sized, once per call) ----
    w1 = jnp.asarray(w1, jnp.float32)
    w2 = jnp.asarray(w2, jnp.float32)
    w3 = jnp.reshape(jnp.asarray(w3, jnp.float32), (H, -1))
    b1 = jnp.reshape(jnp.asarray(b1, jnp.float32), (1, -1))   # robust to (H,) biases
    b2 = jnp.reshape(jnp.asarray(b2, jnp.float32), (1, -1))
    b3 = jnp.reshape(jnp.asarray(b3, jnp.float32), (1, 1))

    # lane-dense hidden dim (exact identity: zero weights/bias -> relu(0)=0)
    Hp = _round_up(H, LANE)
    if Hp != H:
        w1 = jnp.pad(w1, ((0, 0), (0, Hp - H)))
        b1 = jnp.pad(b1, ((0, 0), (0, Hp - H)))
        w2 = jnp.pad(w2, ((0, Hp - H), (0, Hp - H)))
        b2 = jnp.pad(b2, ((0, 0), (0, Hp - H)))
        w3 = jnp.pad(w3, ((0, Hp - H), (0, 0)))
    # lane-dense fc3 output: pad the single output column to a full lane width
    w3 = jnp.pad(w3, ((0, 0), (0, LANE - w3.shape[1])))

    # bf16 MXU operands (accumulation stays f32 inside the kernel)
    w1 = w1.astype(jnp.bfloat16)
    w2 = w2.astype(jnp.bfloat16)
    w3 = w3.astype(jnp.bfloat16)

    # fuse the concat host-side: one input stream, one fc1 weight
    x = jnp.concatenate([state, action], axis=-1)             # (B, S+A) f32

    # ---- batch tiling: keep >= ~4 grid steps at realistic batch sizes so the
    # 'parallel' axis can be split across v7x's two TensorCores and the
    # pipeline overlaps DMA with compute on all generations. ----
    TM = max(SUBLANE, min(block_b, _round_up(_cdiv(B, 4), SUBLANE)))
    Bp = _round_up(B, TM)
    if Bp != B:
        x = jnp.pad(x, ((0, Bp - B), (0, 0)))
    grid = (Bp // TM,)

    resident = pl.Buffered(1)   # grid-invariant blocks: single VMEM buffer

    def const_spec(shape):
        return pl.BlockSpec(shape, lambda i: (0, 0), pipeline_mode=resident)

    in_specs = [
        pl.BlockSpec((TM, K), lambda i: (i, 0)),                 # x tile
        const_spec((K, Hp)),                                     # w1
        const_spec((1, Hp)),                                     # b1
        const_spec((Hp, Hp)),                                    # w2
        const_spec((1, Hp)),                                     # b2
        const_spec((Hp, LANE)),                                  # w3 (lane-padded)
        pl.BlockSpec(memory_space=pltpu.MemorySpace.SMEM),       # b3 scalar
    ]
    out_spec = pl.BlockSpec((TM, LANE), lambda i: (i, 0))

    # explicit VMEM budget from the actual working set (weights single-buffered,
    # activation / output streams double-buffered, f32 intermediates) + margin
    weight_bytes = 2 * (K * Hp + Hp * Hp + Hp * LANE) + 4 * 2 * Hp
    stream_bytes = 2 * (TM * K * 4) + 2 * (TM * LANE * 4)
    live_bytes = 4 * TM * Hp * 3
    vmem_limit = int(min(64 * 1024 * 1024,
                         max(4 * 1024 * 1024,
                             2 * (weight_bytes + stream_bytes + live_bytes))))

    flops = 2 * Bp * (K * Hp + Hp * Hp + Hp * LANE)
    bytes_accessed = int(Bp * K * 4 + weight_bytes + Bp * LANE * 4)

    out = pl.pallas_call(
        critic_kernel,
        out_shape=jax.ShapeDtypeStruct((Bp, LANE), jnp.float32),
        grid=grid,
        in_specs=in_specs,
        out_specs=out_spec,
        compiler_params=pltpu.CompilerParams(
            dimension_semantics=("parallel",),
            vmem_limit_bytes=vmem_limit,
        ),
        cost_estimate=pl.CostEstimate(
            flops=flops, transcendentals=0, bytes_accessed=bytes_accessed),
    )(x, w1, b1, w2, b2, w3, b3)

    return out[:B, 0:1]


def init_critic_params(key, state_dim, hidden_dim, action_dim):
    """torch.nn.Linear-style init (U[-1/sqrt(fan_in), 1/sqrt(fan_in)]), W:(in,out)."""
    def linear(k, fan_in, fan_out):
        kw, kb = jax.random.split(k)
        bound = 1.0 / jnp.sqrt(jnp.float32(fan_in))
        w = jax.random.uniform(kw, (fan_in, fan_out), jnp.float32, -bound, bound)
        b = jax.random.uniform(kb, (1, fan_out), jnp.float32, -bound, bound)
        return w, b

    k1, k2, k3 = jax.random.split(key, 3)
    w1, b1 = linear(k1, state_dim + action_dim, hidden_dim)
    w2, b2 = linear(k2, hidden_dim, hidden_dim)
    w3, b3 = linear(k3, hidden_dim, 1)
    return (w1, b1, w2, b2, w3, b3)


def critic_ref(state, action, params):
    """Pure f32 JAX reference (exact torch semantics)."""
    w1, b1, w2, b2, w3, b3 = params
    x = jnp.concatenate([state, action], axis=-1)
    x = jnp.maximum(x @ w1 + b1, 0.0)
    x = jnp.maximum(x @ w2 + b2, 0.0)
    return x @ w3 + b3


def critic_ref_bf16(state, action, params):
    """Reference matching the kernel's bf16-MXU / f32-accumulate numerics."""
    w1, b1, w2, b2, w3, b3 = params
    bf = jnp.bfloat16
    x = jnp.concatenate([state, action], axis=-1).astype(bf)
    h1 = jnp.maximum(
        jnp.dot(x, w1.astype(bf), preferred_element_type=jnp.float32) + b1, 0.0)
    h2 = jnp.maximum(
        jnp.dot(h1.astype(bf), w2.astype(bf), preferred_element_type=jnp.float32) + b2, 0.0)
    return jnp.dot(h2.astype(bf), w3.astype(bf),
                   preferred_element_type=jnp.float32) + jnp.reshape(b3, (1, -1))


if __name__ == "__main__":
    # Small shapes consistent with Critic(state_dim, hidden_dim, action_dim)
    B, STATE_DIM, HIDDEN_DIM, ACTION_DIM = 2, 12, 32, 4

    key = jax.random.PRNGKey(0)
    k_params, k_state, k_action = jax.random.split(key, 3)

    params = init_critic_params(k_params, STATE_DIM, HIDDEN_DIM, ACTION_DIM)
    state = jax.random.normal(k_state, (B, STATE_DIM), jnp.float32)
    action = jax.random.normal(k_action, (B, ACTION_DIM), jnp.float32)

    q = jax.block_until_ready(critic_forward(state, action, params))

    q_ref16 = critic_ref_bf16(state, action, params)   # same bf16-MXU numerics
    q_ref32 = critic_ref(state, action, params)        # exact f32 torch semantics

    assert q.shape == (B, 1), q.shape
    assert jnp.allclose(q, q_ref16, atol=2e-3, rtol=2e-3), (q, q_ref16)
    assert jnp.allclose(q, q_ref32, atol=5e-2, rtol=5e-2), (q, q_ref32)

    print("KERNEL_OK")
</pallas_src>

<mosaic_0001>
module attributes {stable_mosaic.version = 11 : i64} {
  func.func @critic_kernel(%arg0: i32, %arg1: memref<8x16xf32, #tpu.memory_space<vmem>>, %arg2: memref<16x128xbf16, #tpu.memory_space<vmem>>, %arg3: memref<1x128xf32, #tpu.memory_space<vmem>>, %arg4: memref<128x128xbf16, #tpu.memory_space<vmem>>, %arg5: memref<1x128xf32, #tpu.memory_space<vmem>>, %arg6: memref<128x128xbf16, #tpu.memory_space<vmem>>, %arg7: memref<1x1xf32, #tpu.memory_space<smem>>, %arg8: memref<8x128xf32, #tpu.memory_space<vmem>>) attributes {dimension_semantics = [#tpu.dimension_semantics<parallel>], iteration_bounds = array<i64: 1>, scalar_prefetch = 0 : i64, scratch_operands = 0 : i64, tpu.core_type = #tpu.core_type<tc>, window_params = [{transform_indices = @transform_0, window_bounds = array<i64: 8, 16>}, {pipeline_mode = #tpu.pipeline_mode<synchronous>, transform_indices = @transform_1, window_bounds = array<i64: 16, 128>}, {pipeline_mode = #tpu.pipeline_mode<synchronous>, transform_indices = @transform_2, window_bounds = array<i64: 1, 128>}, {pipeline_mode = #tpu.pipeline_mode<synchronous>, transform_indices = @transform_3, window_bounds = array<i64: 128, 128>}, {pipeline_mode = #tpu.pipeline_mode<synchronous>, transform_indices = @transform_4, window_bounds = array<i64: 1, 128>}, {pipeline_mode = #tpu.pipeline_mode<synchronous>, transform_indices = @transform_5, window_bounds = array<i64: 128, 128>}, {transform_indices = @transform_6, window_bounds = array<i64: 1, 1>}, {transform_indices = @transform_7, window_bounds = array<i64: 8, 128>}]} {
    %c0 = arith.constant 0 : index
    %c0_0 = arith.constant 0 : index
    %0 = vector.load %arg1[%c0, %c0_0] : memref<8x16xf32, #tpu.memory_space<vmem>>, vector<8x16xf32>
    %1 = arith.truncf %0 : vector<8x16xf32> to vector<8x16xbf16>
    %c0_1 = arith.constant 0 : index
    %c0_2 = arith.constant 0 : index
    %2 = vector.load %arg2[%c0_1, %c0_2] : memref<16x128xbf16, #tpu.memory_space<vmem>>, vector<16x128xbf16>
    %cst = arith.constant dense<0.000000e+00> : vector<8x128xf32>
    %3 = tpu.matmul %1, %2, %cst {dimension_numbers = #tpu.dot_dimension_numbers<[1], [0], [0], [1], [0, 0, 1, 1], [], []>} : vector<8x16xbf16>, vector<16x128xbf16>, vector<8x128xf32> -> vector<8x128xf32>
    %c0_3 = arith.constant 0 : index
    %c0_4 = arith.constant 0 : index
    %4 = vector.load %arg3[%c0_3, %c0_4] : memref<1x128xf32, #tpu.memory_space<vmem>>, vector<1x128xf32>
    %5 = vector.broadcast %4 : vector<1x128xf32> to vector<8x128xf32>
    %6 = arith.addf %3, %5 : vector<8x128xf32>
    %cst_5 = arith.constant 0.000000e+00 : f32
    %7 = vector.broadcast %cst_5 : f32 to vector<8x128xf32>
    %8 = arith.maximumf %6, %7 : vector<8x128xf32>
    %9 = arith.truncf %8 : vector<8x128xf32> to vector<8x128xbf16>
    %c0_6 = arith.constant 0 : index
    %c0_7 = arith.constant 0 : index
    %10 = vector.load %arg4[%c0_6, %c0_7] : memref<128x128xbf16, #tpu.memory_space<vmem>>, vector<128x128xbf16>
    %cst_8 = arith.constant dense<0.000000e+00> : vector<8x128xf32>
    %11 = tpu.matmul %9, %10, %cst_8 {dimension_numbers = #tpu.dot_dimension_numbers<[1], [0], [0], [1], [0, 0, 1, 1], [], []>} : vector<8x128xbf16>, vector<128x128xbf16>, vector<8x128xf32> -> vector<8x128xf32>
    %c0_9 = arith.constant 0 : index
    %c0_10 = arith.constant 0 : index
    %12 = vector.load %arg5[%c0_9, %c0_10] : memref<1x128xf32, #tpu.memory_space<vmem>>, vector<1x128xf32>
    %13 = vector.broadcast %12 : vector<1x128xf32> to vector<8x128xf32>
    %14 = arith.addf %11, %13 : vector<8x128xf32>
    %cst_11 = arith.constant 0.000000e+00 : f32
    %15 = vector.broadcast %cst_11 : f32 to vector<8x128xf32>
    %16 = arith.maximumf %14, %15 : vector<8x128xf32>
    %17 = arith.truncf %16 : vector<8x128xf32> to vector<8x128xbf16>
    %c0_12 = arith.constant 0 : index
    %c0_13 = arith.constant 0 : index
    %18 = vector.load %arg6[%c0_12, %c0_13] : memref<128x128xbf16, #tpu.memory_space<vmem>>, vector<128x128xbf16>
    %cst_14 = arith.constant dense<0.000000e+00> : vector<8x128xf32>
    %19 = tpu.matmul %17, %18, %cst_14 {dimension_numbers = #tpu.dot_dimension_numbers<[1], [0], [0], [1], [0, 0, 1, 1], [], []>} : vector<8x128xbf16>, vector<128x128xbf16>, vector<8x128xf32> -> vector<8x128xf32>
    %c0_15 = arith.constant 0 : index
    %c0_16 = arith.constant 0 : index
    %20 = memref.load %arg7[%c0_15, %c0_16] : memref<1x1xf32, #tpu.memory_space<smem>>
    %21 = vector.broadcast %20 : f32 to vector<8x128xf32>
    %22 = arith.addf %19, %21 : vector<8x128xf32>
    %c0_17 = arith.constant 0 : index
    %c0_18 = arith.constant 0 : index
    %23 = vector.load %arg8[%c0_17, %c0_18] : memref<8x128xf32, #tpu.memory_space<vmem>>, vector<8x128xf32>
    tpu.vector_store %arg8[%c0_17, %c0_18], %22 {strides = array<i32>} : memref<8x128xf32, #tpu.memory_space<vmem>>, vector<8x128xf32>,
    return
  }
  func.func @transform_0(%arg0: i32) -> (i32, i32) {
    %c0_i32 = arith.constant 0 : i32
    %c0_i32_0 = arith.constant 0 : i32
    return %arg0, %c0_i32 : i32, i32
  }
  func.func @transform_1(%arg0: i32) -> (i32, i32) {
    %c0_i32 = arith.constant 0 : i32
    %c0_i32_0 = arith.constant 0 : i32
    %c0_i32_1 = arith.constant 0 : i32
    return %c0_i32, %c0_i32_0 : i32, i32
  }
  func.func @transform_2(%arg0: i32) -> (i32, i32) {
    %c0_i32 = arith.constant 0 : i32
    %c0_i32_0 = arith.constant 0 : i32
    %c0_i32_1 = arith.constant 0 : i32
    return %c0_i32, %c0_i32_0 : i32, i32
  }
  func.func @transform_3(%arg0: i32) -> (i32, i32) {
    %c0_i32 = arith.constant 0 : i32
    %c0_i32_0 = arith.constant 0 : i32
    %c0_i32_1 = arith.constant 0 : i32
    return %c0_i32, %c0_i32_0 : i32, i32
  }
  func.func @transform_4(%arg0: i32) -> (i32, i32) {
    %c0_i32 = arith.constant 0 : i32
    %c0_i32_0 = arith.constant 0 : i32
    %c0_i32_1 = arith.constant 0 : i32
    return %c0_i32, %c0_i32_0 : i32, i32
  }
  func.func @transform_5(%arg0: i32) -> (i32, i32) {
    %c0_i32 = arith.constant 0 : i32
    %c0_i32_0 = arith.constant 0 : i32
    %c0_i32_1 = arith.constant 0 : i32
    return %c0_i32, %c0_i32_0 : i32, i32
  }
  func.func @transform_6(%arg0: i32) -> (i32, i32) {
    %c0_i32 = arith.constant 0 : i32
    %c0_i32_0 = arith.constant 0 : i32
    %c0_i32_1 = arith.constant 0 : i32
    return %c0_i32, %c0_i32_0 : i32, i32
  }
  func.func @transform_7(%arg0: i32) -> (i32, i32) {
    %c0_i32 = arith.constant 0 : i32
    %c0_i32_0 = arith.constant 0 : i32
    return %arg0, %c0_i32 : i32, i32
  }
}

</mosaic_0001>

<bundles_post_ra>
// kernel: tpu_custom_call.1
= control target key start
LH: loop header
LB: loop body
LE: loop exit
PB: predicated region body
PF: predicated region fallthrough
CT: control target
= control target key end

     0   :  { %13 = vsyncpa [#allocation4], 0  ;;  %s759_s0 = inlined_call_operand.hbm [shape: f32[8,16], index: 0, kind: input, shape index: {}]   ;;  %s760_s1 = inlined_call_operand.hbm [shape: bf16[16,128], index: 1, kind: input, shape index: {}]   ;;  %s761_s2 = inlined_call_operand.vmem [shape: f32[1,128], index: 2, kind: input, shape index: {}]   ;;  %s762_s3 = inlined_call_operand.hbm [shape: bf16[128,128], index: 3, kind: input, shape index: {}]   ;;  %s763_s4 = inlined_call_operand.vmem [shape: f32[1,128], index: 4, kind: input, shape index: {}]   ;;  %s764_s5 = inlined_call_operand.hbm [shape: bf16[128,128], index: 5, kind: input, shape index: {}]   ;;  %s765_s6 = inlined_call_operand.<no memory space> [shape: f32[1,1], index: 6, kind: input, shape index: {}]   ;;  %s766_s7 = inlined_call_operand.hbm [shape: f32[8,128], index: 7, kind: output, shape index: {}]  }
   0x1   :  { %14 = vsyncpa [#allocation7], 0 }
   0x2   :  { %15 = vsyncpa [#allocation10], 0 }
   0x3   :  { %16 = vsyncpa [#allocation5], 0  ;;  %s612_s24 = smov [#allocation6]   ;;  %s494_s28 = scalar_lea.hbm %s760_s1, 128 }
   0x4   :  { %s32_s25 = sshll.u32 %s612_s24, 4  ;;  %p495_p0 = scmp.ne.s32.totalorder %s760_s1, %s494_s28  ;;  %s33_s25 = int_to_ptr.vmem [resolvable:$true] %s32_s25 }
   0x5   :  { %p498_p1 = scmp.lt.u32.totalorder %s494_s28, %s760_s1 }
   0x7   :  { %p500_p2 = pnand %p498_p1, %p495_p0 }
   0x9   :  { %503 = shalt.err (!%p500_p2)
}
   0xa   :  { %s504_s10 = scalar_lea.vmem %s33_s25, 128  ;;  %p509_p4 = scmp.lt.s32.totalorder %s33_s25, %s33_s25 }
   0xb   :  { %p505_p3 = scmp.ne.s32.totalorder %s33_s25, %s504_s10  ;;  %p510_p5 = scmp.lt.s32.totalorder %s504_s10, %s504_s10 }
   0xd   :  { %p511_p6 = por %p510_p5, %p509_p4 }
   0xf   :  { %p512_p7 = pnand %p511_p6, %p505_p3 }
  0x11   :  { %515 = shalt.err (!%p512_p7)
}
  0x12   :  { %s613_s11 = smov 64   ;;  %s614_s12 = smov 4  }
  0x13   :  { %38 = dma.hbm_to_vmem [thread:$0]  %s760_s1, 128, %s33_s25, [#allocation7], %s613_s11, %s613_s11, %s614_s12  }
  0x14   :  { %s615_s15 = smov [#allocation3]   ;;  %s616_s17 = smov [#allocation8]  }
  0x15   :  { %s23_s16 = sshll.u32 %s615_s15, 4  ;;  %s46_s18 = sshll.u32 %s616_s17, 4  ;;  %s24_s16 = int_to_ptr.vmem [resolvable:$true] %s23_s16  ;;  %s47_s18 = int_to_ptr.vmem [resolvable:$true] %s46_s18 }
  0x16   :  { %s516_s21 = scalar_lea.hbm %s759_s0, 128 }
  0x17   :  { %p517_p8 = scmp.ne.s32.totalorder %s759_s0, %s516_s21  ;;  %p520_p9 = scmp.lt.u32.totalorder %s516_s21, %s759_s0 }
  0x19   :  { %p522_p10 = pnand %p520_p9, %p517_p8 }
  0x1b   :  { %525 = shalt.err (!%p522_p10)
}
  0x1c   :  { %s526_s1 = scalar_lea.vmem %s24_s16, 128  ;;  %p531_p12 = scmp.lt.s32.totalorder %s24_s16, %s24_s16 }
  0x1d   :  { %p527_p11 = scmp.ne.s32.totalorder %s24_s16, %s526_s1  ;;  %p532_p13 = scmp.lt.s32.totalorder %s526_s1, %s526_s1 }
  0x1f   :  { %p533_p0 = por %p532_p13, %p531_p12 }
  0x21   :  { %p534_p1 = pnand %p533_p0, %p527_p11 }
  0x23   :  { %537 = shalt.err (!%p534_p1)
}
  0x24   :  { %26 = dma.hbm_to_vmem [thread:$0]  %s759_s0, 128, %s24_s16, [#allocation4]  }
  0x25   :  { %s538_s30 = scalar_lea.hbm %s762_s3, 1024 }
  0x26   :  { %p539_p2 = scmp.ne.s32.totalorder %s762_s3, %s538_s30  ;;  %p542_p3 = scmp.lt.u32.totalorder %s538_s30, %s762_s3 }
  0x28   :  { %p544_p4 = pnand %p542_p3, %p539_p2 }
  0x2a   :  { %547 = shalt.err (!%p544_p4)
}
  0x2b   :  { %s548_s14 = scalar_lea.vmem %s47_s18, 1024  ;;  %p553_p6 = scmp.lt.s32.totalorder %s47_s18, %s47_s18 }
  0x2c   :  { %p549_p5 = scmp.ne.s32.totalorder %s47_s18, %s548_s14  ;;  %p554_p7 = scmp.lt.s32.totalorder %s548_s14, %s548_s14 }
  0x2e   :  { %p555_p8 = por %p554_p7, %p553_p6 }
  0x30   :  { %p556_p9 = pnand %p555_p8, %p549_p5 }
  0x32   :  { %559 = shalt.err (!%p556_p9)
}
  0x33   :  { %52 = dma.hbm_to_vmem [thread:$0]  %s762_s3, 1024, %s47_s18, [#allocation7], %s613_s11, %s613_s11, %s614_s12  }
  0x34   :  { %s617_s16 = smov [#allocation9]   ;;  %s560_s21 = scalar_lea.hbm %s764_s5, 1024 }
  0x35   :  { %s60_s17 = sshll.u32 %s617_s16, 4  ;;  %p561_p10 = scmp.ne.s32.totalorder %s764_s5, %s560_s21  ;;  %s61_s17 = int_to_ptr.vmem [resolvable:$true] %s60_s17 }
  0x36   :  { %p564_p11 = scmp.lt.u32.totalorder %s560_s21, %s764_s5 }
  0x38   :  { %p566_p12 = pnand %p564_p11, %p561_p10 }
  0x3a   :  { %569 = shalt.err (!%p566_p12)
}
  0x3b   :  { %s570_s1 = scalar_lea.vmem %s61_s17, 1024  ;;  %p575_p0 = scmp.lt.s32.totalorder %s61_s17, %s61_s17 }
  0x3c   :  { %p571_p13 = scmp.ne.s32.totalorder %s61_s17, %s570_s1  ;;  %p576_p1 = scmp.lt.s32.totalorder %s570_s1, %s570_s1 }
  0x3e   :  { %p577_p2 = por %p576_p1, %p575_p0 }
  0x40   :  { %p578_p3 = pnand %p577_p2, %p571_p13 }
  0x42   :  { %581 = shalt.err (!%p578_p3)
}
  0x43   :  { %66 = dma.hbm_to_vmem [thread:$0]  %s764_s5, 1024, %s61_s17, [#allocation10], %s613_s11, %s613_s11, %s614_s12  }
  0x44   :  { %604 = dma.done.wait [#allocation4], 128  }
  0x45   :  { %605 = vsyncadd [#allocation4], 4294967168 }
  0x46   :  { %606 = dma.done.wait [#allocation7], 1152  }
  0x47   :  { %607 = vsyncadd [#allocation7], 4294966144 }
  0x48   :  { %608 = dma.done.wait [#allocation10], 1024  }
  0x49   :  { %609 = vsyncadd [#allocation10], 4294966272  ;;  %v618_v0 = vmov 0.0   ;;  %vm619_vm0 = vmmov 0   ;;  %v477_v1 = vld [vmem:[#allocation6] sm:$0xff]   ;;  %v82_v2 = vld [vmem:[#allocation3] sm:$0xff]  ;;  %v275_v36 = vstv %s765_s6 }
  0x4a   :  { %422 = vmatprep.subr.bf16.mxu0 %v618_v0  ;;  %424 = vmatprep.mubr.msk.bf16.mxu0 %vm619_vm0, %v618_v0  ;;  %v83_v3 = vpack.c.bf16 %v82_v2, %v82_v2  ;;  %vm99_vm1 = vcmask 130048   ;;  %v478_v4 = vld [vmem:[#allocation8] sm:$0xff]   ;;  %v479_v5 = vld [vmem:[#allocation8 + $0x8] sm:$0xff]   ;;  %v480_v6 = vld [vmem:[#allocation8 + $0x10] sm:$0xff]   ;;  %s620_s28 = smov [#allocation11]  }
  0x4b   :  { %428 = vmatprep.subr.bf16.mxu1 %v618_v0  ;;  %444 = vmatprep.mubr.msk.bf16.mxu1 %vm619_vm0, %v618_v0  ;;  %v481_v7 = vld [vmem:[#allocation8 + $0x18] sm:$0xff]   ;;  %v482_v8 = vld [vmem:[#allocation8 + $0x20] sm:$0xff]   ;;  %v483_v9 = vld [vmem:[#allocation8 + $0x28] sm:$0xff]   ;;  %s371_s29 = sshll.u32 %s620_s28, 4  ;;  %s372_s29 = int_to_ptr.vmem [resolvable:$true] %s371_s29 }
  0x4c   :  { %423 = vmatpush3.bf16.msra.mxu0 %v477_v1  ;;  %429 = vmatpush3.bf16.msra.mxu1 %v478_v4  ;;  %v484_v10 = vld [vmem:[#allocation8 + $0x30] sm:$0xff]   ;;  %v485_v11 = vld [vmem:[#allocation8 + $0x38] sm:$0xff]   ;;  %v486_v12 = vld [vmem:[#allocation9] sm:$0xff]   ;;  %p587_p5 = scmp.lt.s32.totalorder %s372_s29, %s372_s29 }
  0x4d   :  { %448 = vmatprep.subr.bf16.mxu0 %v618_v0  ;;  %430 = vmatprep.subr.bf16.mxu1 %v618_v0  ;;  %v487_v13 = vld [vmem:[#allocation9 + $0x8] sm:$0xff]   ;;  %v488_v14 = vld [vmem:[#allocation9 + $0x10] sm:$0xff]   ;;  %v489_v15 = vld [vmem:[#allocation9 + $0x18] sm:$0xff]  }
  0x4e   :  { %v490_v16 = vld [vmem:[#allocation9 + $0x20] sm:$0xff]   ;;  %v491_v17 = vld [vmem:[#allocation9 + $0x28] sm:$0xff]   ;;  %v382_v18 = vld [vmem:[%s761_s2] ss:$0 sm:$0xff] }
  0x4f   :  { %425 = vmatmul.mubr.msk.bf16.vlgmr.msra.gmra.mrb[0].mxu0 %vm99_vm1, %v83_v3  ;;  %v492_v26 = vld [vmem:[#allocation9 + $0x30] sm:$0xff]   ;;  %v493_v27 = vld [vmem:[#allocation9 + $0x38] sm:$0xff]  }
  0x50   :  { %464 = vmatprep.mubr.msk.bf16.mxu0 %vm619_vm0, %v618_v0  ;;  %431 = vmatpush3.bf16.msra.mxu1 %v479_v5  ;;  %v385_v28 = vld [vmem:[%s763_s4] ss:$0 sm:$0xff]  ;;  %s582_s4 = scalar_lea.vmem %s372_s29, 128 }
  0x51   :  { %432 = vmatprep.subr.bf16.mxu1 %v618_v0  ;;  %449 = vmatpush3.bf16.msra.mxu0 %v486_v12  ;;  %p583_p4 = scmp.ne.s32.totalorder %s372_s29, %s582_s4  ;;  %p588_p6 = scmp.lt.s32.totalorder %s582_s4, %s582_s4 }
  0x52   :  { %450 = vmatprep.subr.bf16.mxu0 %v618_v0 }
  0x53   :  { %p589_p7 = por %p588_p6, %p587_p5 }
  0x54   :  { %433 = vmatpush3.bf16.msra.mxu1 %v480_v6 }
  0x55   :  { %434 = vmatprep.subr.bf16.mxu1 %v618_v0  ;;  %451 = vmatpush3.bf16.msra.mxu0 %v487_v13  ;;  %p590_p8 = pnand %p589_p7, %p583_p4 }
  0x56   :  { %452 = vmatprep.subr.bf16.mxu0 %v618_v0 }
  0x58   :  { %435 = vmatpush3.bf16.msra.mxu1 %v481_v7 }
  0x59   :  { %436 = vmatprep.subr.bf16.mxu1 %v618_v0  ;;  %453 = vmatpush3.bf16.msra.mxu0 %v488_v14 }
  0x5a   :  { %454 = vmatprep.subr.bf16.mxu0 %v618_v0 }
  0x5c   :  { %437 = vmatpush3.bf16.msra.mxu1 %v482_v8 }
  0x5d   :  { %438 = vmatprep.subr.bf16.mxu1 %v618_v0  ;;  %455 = vmatpush3.bf16.msra.mxu0 %v489_v15 }
  0x5e   :  { %456 = vmatprep.subr.bf16.mxu0 %v618_v0 }
  0x60   :  { %439 = vmatpush3.bf16.msra.mxu1 %v483_v9 }
  0x61   :  { %440 = vmatprep.subr.bf16.mxu1 %v618_v0  ;;  %457 = vmatpush3.bf16.msra.mxu0 %v490_v16 }
  0x62   :  { %458 = vmatprep.subr.bf16.mxu0 %v618_v0 }
  0x64   :  { %441 = vmatpush3.bf16.msra.mxu1 %v484_v10 }
  0x65   :  { %442 = vmatprep.subr.bf16.mxu1 %v618_v0  ;;  %459 = vmatpush3.bf16.msra.mxu0 %v491_v17 }
  0x66   :  { %460 = vmatprep.subr.bf16.mxu0 %v618_v0 }
  0x68   :  { %443 = vmatpush3.bf16.msra.mxu1 %v485_v11 }
  0x69   :  { %461 = vmatpush3.bf16.msra.mxu0 %v492_v26 }
  0x6a   :  { %462 = vmatprep.subr.bf16.mxu0 %v618_v0 }
  0x6d   :  { %463 = vmatpush3.bf16.msra.mxu0 %v493_v27 }
 0x122   :  { %v137_v19 = vpop.f32.mrb[0].mxu0 }
 0x123   :  { %v138_v20 = vadd.f32 %v382_v18, %v137_v19  ;;  %v426_v21 = vpop.f32.mrb[1].mxu0 }
 0x124   :  { %v140_v22 = vpop.f32.mrb[2].mxu0 }
 0x125   :  { %v143_v23 = vmax.f32 %v138_v20, 0.0  ;;  %v427_v24 = vpop.f32.mrb[3].mxu0 }
 0x127   :  { %v144_v25 = vpack.c.bf16 %v143_v23, %v143_v23 }
 0x129   :  { %445 = vmatmul.mubr.bf16.vlgmr.msra.gmra.mrb[0].mxu1 %v144_v25 }
 0x1fc   :  { %v250_v29 = vpop.f32.mrb[0].mxu1 }
 0x1fd   :  { %v251_v30 = vadd.f32 %v385_v28, %v250_v29  ;;  %v446_v31 = vpop.f32.mrb[1].mxu1 }
 0x1fe   :  { %v253_v32 = vpop.f32.mrb[2].mxu1 }
 0x1ff   :  { %v256_v33 = vmax.f32 %v251_v30, 0.0  ;;  %v447_v34 = vpop.f32.mrb[3].mxu1 }
 0x201   :  { %v257_v35 = vpack.c.bf16 %v256_v33, %v256_v33 }
 0x203   :  { %465 = vmatmul.mubr.bf16.vlgmr.msra.gmra.mrb[4].mxu0 %v257_v35 }
 0x2d6   :  { %v358_v37 = vpop.f32.mrb[4].mxu0 }
 0x2d7   :  { %v359_v38 = vadd.f32 %v358_v37, %v275_v36  ;;  %v466_v39 = vpop.f32.mrb[5].mxu0 }
 0x2d8   :  { %v361_v40 = vpop.f32.mrb[6].mxu0 }
 0x2d9   :  { %364 = vst [vmem:[#allocation11] sm:$0xff] %v359_v38  ;;  %v467_v41 = vpop.f32.mrb[7].mxu0 }
 0x2da   :  { %593 = shalt.err (!%p590_p8)
}
 0x2db   :  { %s594_s6 = scalar_lea.hbm %s766_s7, 128 }
 0x2dc   :  { %p595_p9 = scmp.ne.s32.totalorder %s766_s7, %s594_s6  ;;  %p598_p10 = scmp.lt.u32.totalorder %s594_s6, %s766_s7 }
 0x2de   :  { %p600_p11 = pnand %p598_p10, %p595_p9 }
 0x2e0   :  { %603 = shalt.err (!%p600_p11)
}
 0x2e1   :  { %374 = dma.vmem_to_hbm [thread:$0]  %s372_s29, 128, %s766_s7, [#allocation5]  }
 0x2e2   :  { %610 = dma.done.wait [#allocation5], 128  }
 0x2e3   :  { %611 = vsyncadd [#allocation5], 4294967168 }
 0x2e4   :  { %378 = vsyncpa [#allocation4], 1 }
 0x2e5   :  { %379 = vsyncpa [#allocation7], 1 }
 0x2e6   :  { %380 = vsyncpa [#allocation10], 1 }
 0x2e7   :  { %381 = vsyncpa [#allocation5], 1 }

</bundles_post_ra>
